<compile_context>
chip_gen: v7x
topology: tpu7x:2x2x1
jax: 0.10.0
libtpu: 0.0.40
codegen_flags: <defaults>
</compile_context>

<pallas_src>
import jax
import jax.numpy as jnp
from jax import lax
from jax.experimental import pallas as pl
from jax.experimental.pallas import tpu as pltpu


def _round_up(x: int, m: int) -> int:
    return ((x + m - 1) // m) * m


def _round_down(x: int, m: int) -> int:
    return (x // m) * m


# ---------------------------------------------------------------------------
# Kernel A (small vocab): MXU one-hot gather.  out = one_hot(ids) @ table.
# ---------------------------------------------------------------------------
def _embed_onehot_kernel(ids_ref, w_ref, out_ref):
    # ids_ref : VMEM i32[T, 1]  per-chunk token ids
    # w_ref   : VMEM  [V, D]    whole table, resident across the grid
    # out_ref : VMEM  [T, D]    dense output chunk
    T = out_ref.shape[0]
    V = w_ref.shape[0]
    ids = ids_ref[...]                                    # (T, 1)
    cols = lax.broadcasted_iota(jnp.int32, (T, V), 1)     # (T, V)
    hot = ids == cols                                     # exact 0/1 mask

    w = w_ref[...]
    if w.dtype == jnp.float32:
        # Deterministic ~1-ulp gather: split f32 into 3 bf16 terms and sum
        # three exact bf16 matmuls (f32 accumulation, LHS is exactly 0/1).
        oh = hot.astype(jnp.bfloat16)
        hi = w.astype(jnp.bfloat16)
        r1 = w - hi.astype(jnp.float32)
        mid = r1.astype(jnp.bfloat16)
        lo = (r1 - mid.astype(jnp.float32)).astype(jnp.bfloat16)
        acc = jnp.dot(oh, hi, preferred_element_type=jnp.float32)
        acc = acc + jnp.dot(oh, mid, preferred_element_type=jnp.float32)
        acc = acc + jnp.dot(oh, lo, preferred_element_type=jnp.float32)
    else:
        acc = jnp.dot(hot.astype(w.dtype), w, preferred_element_type=jnp.float32)

    out_ref[...] = acc.astype(out_ref.dtype)


# ---------------------------------------------------------------------------
# Kernel B (larger vocab, table still VMEM resident): exact row copies staged
# 8 rows at a time -> one dense (8, D) store per group.
# ---------------------------------------------------------------------------
def _embed_staged_kernel(ids_ref, w_ref, out_ref):
    # ids_ref : SMEM i32[T]   per-chunk token ids (blocked SMEM window)
    # w_ref   : VMEM  [V, D]  whole table, resident across the grid
    # out_ref : VMEM  [T, D]
    T = out_ref.shape[0]

    def group(g, carry):
        off = pl.multiple_of(g * 8, 8)
        rows = [w_ref[pl.ds(ids_ref[off + r], 1), :] for r in range(8)]
        out_ref[pl.ds(off, 8), :] = jnp.concatenate(rows, axis=0)
        return carry

    lax.fori_loop(0, T // 8, group, 0, unroll=2)


def _vmem_capacity_bytes() -> int:
    try:
        return int(pltpu.get_tpu_info().vmem_capacity_bytes)
    except Exception:
        return 64 << 20        # conservative default: v7x per-TensorCore VMEM


def _make_spec(shape, index_map, pipeline_mode=None, **kw):
    # Only pass pipeline_mode when requested so the no-hints fallback works
    # even on JAX versions without that BlockSpec parameter.
    if pipeline_mode is None:
        return pl.BlockSpec(shape, index_map, **kw)
    return pl.BlockSpec(shape, index_map, pipeline_mode=pipeline_mode, **kw)


def optimal_noise_embedding_fwd(input_ids, weight, *, block_tokens: int = 1024):
    """input_ids: [B, S] int, weight: [V, D] float -> [B, S, D] = weight[input_ids]."""
    B, S = input_ids.shape
    V, D = weight.shape
    n_tok = B * S
    itemsize = jnp.dtype(weight.dtype).itemsize
    table_bytes = V * D * itemsize

    vmem_cap = _vmem_capacity_bytes()
    budget = int(vmem_cap * 0.8)

    # --- path selection ------------------------------------------------------
    # Budget conservatively for 2 weight buffers in case Buffered(1) is unused.
    if 2 * table_bytes + (4 << 20) > budget:
        # TODO(synk): manually double-buffered per-row DMA gather (weight in
        # memory_space=pl.ANY, several outstanding pltpu.make_async_copy per
        # chunk) for tables beyond the VMEM budget; use XLA's gather for now.
        flat = input_ids.reshape(n_tok).astype(jnp.int32)
        return jnp.take(weight, flat, axis=0).reshape(B, S, D)

    # MXU one-hot path only while (T, V) one-hot / split temporaries stay small;
    # otherwise exact staged row copies.
    use_onehot = (V <= 1024) and (table_bytes <= (2 << 20))

    # --- chunk size T (multiple of 8, VMEM- and megacore-aware) --------------
    per_tok = 4 * D * itemsize + (V * 4 if use_onehot else 0) + 1024
    avail = budget - 2 * table_bytes - (1 << 20)
    t_vmem = max(8, _round_down(max(avail, 0) // per_tok, 8))
    cap = min(block_tokens, t_vmem)
    if n_tok >= 16:
        # >= 2 chunks so both v7x TensorCores get work on the "parallel" axis.
        cap = min(cap, _round_up(pl.cdiv(n_tok, 2), 8))
    else:
        cap = min(cap, _round_up(n_tok, 8))
    cap = max(8, _round_down(cap, 8))

    T = cap
    if n_tok % 8 == 0:
        # Prefer a chunk size dividing n_tok: no padded rows and no trailing
        # out[:n_tok] copy (extra HBM traffic) after the kernel.
        t = cap
        while t >= 8:
            if n_tok % t == 0:
                T = t
                break
            t -= 8

    n_tok_pad = _round_up(n_tok, T)
    n_chunks = n_tok_pad // T

    flat_ids = input_ids.reshape(n_tok).astype(jnp.int32)
    if n_tok_pad != n_tok:
        flat_ids = jnp.pad(flat_ids, (0, n_tok_pad - n_tok))   # pad with valid id 0

    # Advisory cost: ids + output + table (x2: each TensorCore of a megacore
    # fetches its own resident copy when the chunk axis is split).
    bytes_accessed = n_tok_pad * 4 + n_tok_pad * D * itemsize + 2 * table_bytes
    if use_onehot:
        n_pass = 3 if itemsize == 4 else 1
        flops = 2 * n_tok_pad * V * D * n_pass
    else:
        flops = 0
    cost = pl.CostEstimate(flops=flops, transcendentals=0,
                           bytes_accessed=bytes_accessed)

    vmem_need = (2 * table_bytes
                 + 4 * T * D * itemsize
                 + (T * V * 4 + 4 * table_bytes if use_onehot else 16 * D * itemsize)
                 + (2 << 20))
    vmem_limit = int(min(max(vmem_need, 8 << 20), int(vmem_cap * 0.9)))
    params = pltpu.CompilerParams(dimension_semantics=("parallel",),
                                  vmem_limit_bytes=vmem_limit)

    def run(use_pipeline_hints: bool):
        # Constant-index table -> 1 buffer; deeper output writeback pipelining.
        pm_w = pl.Buffered(1) if use_pipeline_hints else None
        pm_o = pl.Buffered(3) if use_pipeline_hints else None
        w_spec = _make_spec((V, D), lambda i: (0, 0), pm_w)
        out_spec = _make_spec((T, D), lambda i: (i, 0), pm_o)
        if use_onehot:
            ids_arg = flat_ids.reshape(n_tok_pad, 1)
            ids_spec = pl.BlockSpec((T, 1), lambda i: (i, 0))
            kernel = _embed_onehot_kernel
        else:
            ids_arg = flat_ids
            ids_spec = pl.BlockSpec((T,), lambda i: (i,), memory_space=pltpu.SMEM)
            kernel = _embed_staged_kernel
        return pl.pallas_call(
            kernel,
            out_shape=jax.ShapeDtypeStruct((n_tok_pad, D), weight.dtype),
            grid=(n_chunks,),
            in_specs=[ids_spec, w_spec],
            out_specs=out_spec,
            compiler_params=params,
            cost_estimate=cost,
        )(ids_arg, weight)

    try:
        out_flat = run(True)
    except Exception:
        # pipeline_mode (Buffered) hints are best-effort; retry without them.
        out_flat = run(False)

    if n_tok_pad != n_tok:
        out_flat = out_flat[:n_tok]
    return out_flat.reshape(B, S, D)


if __name__ == "__main__":
    # Module hyper-parameters (small, but consistent with the module).
    vocab_size = 64
    embedding_dim = 128   # lane-aligned
    pad_token_id = 0
    B, S = 2, 8

    key = jax.random.PRNGKey(0)
    k_w, k_ids = jax.random.split(key)

    # Deterministic parameter init, matching weight.data.normal_(0.0, 1.0).
    weight = jax.random.normal(k_w, (vocab_size, embedding_dim), dtype=jnp.float32)

    # Example inputs (include the pad token id among them).
    input_ids = jax.random.randint(k_ids, (B, S), 0, vocab_size, dtype=jnp.int32)
    input_ids = input_ids.at[0, 0].set(pad_token_id)

    out = optimal_noise_embedding_fwd(input_ids, weight)
    out = jax.block_until_ready(out)

    # Reference: plain row gather (nn.Embedding forward after the normal_ init).
    ref = weight[input_ids]
    assert out.shape == (B, S, embedding_dim)
    assert out.dtype == weight.dtype
    assert jnp.allclose(out, ref, rtol=1e-5, atol=1e-6), "mismatch vs reference gather"

    print("KERNEL_OK")
</pallas_src>

<mosaic_0001>
module attributes {stable_mosaic.version = 11 : i64} {
  func.func @_embed_onehot_kernel(%arg0: i32, %arg1: memref<8x1xi32, #tpu.memory_space<vmem>>, %arg2: memref<64x128xf32, #tpu.memory_space<vmem>>, %arg3: memref<8x128xf32, #tpu.memory_space<vmem>>) attributes {dimension_semantics = [#tpu.dimension_semantics<parallel>], iteration_bounds = array<i64: 2>, scalar_prefetch = 0 : i64, scratch_operands = 0 : i64, tpu.core_type = #tpu.core_type<tc>, window_params = [{transform_indices = @transform_0, window_bounds = array<i64: 8, 1>}, {pipeline_mode = #tpu.pipeline_mode<synchronous>, transform_indices = @transform_1, window_bounds = array<i64: 64, 128>}, {transform_indices = @transform_2, window_bounds = array<i64: 8, 128>}]} {
    %c0 = arith.constant 0 : index
    %c0_0 = arith.constant 0 : index
    %0 = vector.load %arg1[%c0, %c0_0] : memref<8x1xi32, #tpu.memory_space<vmem>>, vector<8x1xi32>
    %1 = tpu.iota {dimensions = array<i32: 1>} : vector<8x64xi32>
    %2 = vector.broadcast %0 : vector<8x1xi32> to vector<8x64xi32>
    %3 = arith.cmpi eq, %2, %1 : vector<8x64xi32>
    %c0_1 = arith.constant 0 : index
    %c0_2 = arith.constant 0 : index
    %4 = vector.load %arg2[%c0_1, %c0_2] : memref<64x128xf32, #tpu.memory_space<vmem>>, vector<64x128xf32>
    %5 = arith.extui %3 : vector<8x64xi1> to vector<8x64xi32>
    %6 = arith.sitofp %5 : vector<8x64xi32> to vector<8x64xf32>
    %7 = arith.truncf %6 : vector<8x64xf32> to vector<8x64xbf16>
    %8 = arith.truncf %4 : vector<64x128xf32> to vector<64x128xbf16>
    %9 = arith.extf %8 : vector<64x128xbf16> to vector<64x128xf32>
    %10 = arith.subf %4, %9 : vector<64x128xf32>
    %11 = arith.truncf %10 : vector<64x128xf32> to vector<64x128xbf16>
    %12 = arith.extf %11 : vector<64x128xbf16> to vector<64x128xf32>
    %13 = arith.subf %10, %12 : vector<64x128xf32>
    %14 = arith.truncf %13 : vector<64x128xf32> to vector<64x128xbf16>
    %cst = arith.constant dense<0.000000e+00> : vector<8x128xf32>
    %15 = tpu.matmul %7, %8, %cst {dimension_numbers = #tpu.dot_dimension_numbers<[1], [0], [0], [1], [0, 0, 1, 1], [], []>} : vector<8x64xbf16>, vector<64x128xbf16>, vector<8x128xf32> -> vector<8x128xf32>
    %cst_3 = arith.constant dense<0.000000e+00> : vector<8x128xf32>
    %16 = tpu.matmul %7, %11, %cst_3 {dimension_numbers = #tpu.dot_dimension_numbers<[1], [0], [0], [1], [0, 0, 1, 1], [], []>} : vector<8x64xbf16>, vector<64x128xbf16>, vector<8x128xf32> -> vector<8x128xf32>
    %17 = arith.addf %15, %16 : vector<8x128xf32>
    %cst_4 = arith.constant dense<0.000000e+00> : vector<8x128xf32>
    %18 = tpu.matmul %7, %14, %cst_4 {dimension_numbers = #tpu.dot_dimension_numbers<[1], [0], [0], [1], [0, 0, 1, 1], [], []>} : vector<8x64xbf16>, vector<64x128xbf16>, vector<8x128xf32> -> vector<8x128xf32>
    %19 = arith.addf %17, %18 : vector<8x128xf32>
    %c0_5 = arith.constant 0 : index
    %c0_6 = arith.constant 0 : index
    %20 = vector.load %arg3[%c0_5, %c0_6] : memref<8x128xf32, #tpu.memory_space<vmem>>, vector<8x128xf32>
    tpu.vector_store %arg3[%c0_5, %c0_6], %19 {strides = array<i32>} : memref<8x128xf32, #tpu.memory_space<vmem>>, vector<8x128xf32>,
    return
  }
  func.func @transform_0(%arg0: i32) -> (i32, i32) {
    %c0_i32 = arith.constant 0 : i32
    %c0_i32_0 = arith.constant 0 : i32
    return %arg0, %c0_i32 : i32, i32
  }
  func.func @transform_1(%arg0: i32) -> (i32, i32) {
    %c0_i32 = arith.constant 0 : i32
    %c0_i32_0 = arith.constant 0 : i32
    %c0_i32_1 = arith.constant 0 : i32
    return %c0_i32, %c0_i32_0 : i32, i32
  }
  func.func @transform_2(%arg0: i32) -> (i32, i32) {
    %c0_i32 = arith.constant 0 : i32
    %c0_i32_0 = arith.constant 0 : i32
    return %arg0, %c0_i32 : i32, i32
  }
}

</mosaic_0001>

<bundles_post_ra>
// kernel: tpu_custom_call.1
= control target key start
LH: loop header
LB: loop body
LE: loop exit
PB: predicated region body
PF: predicated region fallthrough
CT: control target
= control target key end

     0   :  { %7 = vsyncpa [#allocation3], 0  ;;  %s828_s0 = inlined_call_operand.vmem [shape: s32[16,1], index: 0, kind: input, shape index: {}]   ;;  %s829_s1 = inlined_call_operand.hbm [shape: f32[64,128], index: 1, kind: input, shape index: {}]   ;;  %s830_s2 = inlined_call_operand.hbm [shape: f32[16,128], index: 2, kind: output, shape index: {}]  }
   0x1   :  { %8 = vsyncpa [#allocation4], 0 }
   0x2   :  { %10 = vsyncpa [#allocation4 + $0x1], 0  ;;  %s674_s9 = smov 0   ;;  %s676_s10 = smov 0  }
   0x3   :  { %s678_s11 = smov 0   ;;  %s680_s12 = smov 0  }
   0x4 LB: > { %s695_s13 = sadd.s32 4294967295, %s650_s12   ;;  %s428_s14 = sadd.s32 4294967294, %s650_s12   ;;  %s650_s12 = sphi %s680_s12, %s846_s12   ;;  %s646_s11 = sphi %s678_s11, %s845_s11   ;;  %s642_s10 = sphi %s676_s10, %s844_s10   ;;  %s638_s9 = sphi %s674_s9, %s843_s9  }
   0x5   : > { %s699_s15 = sadd.s32 1, %s650_s12   ;;  %s70_s16 = sadd.s32 1, %s646_s11 }
   0x6   : > { %s67_s17 = ssub.s32 %s650_s12, %s699_s15  ;;  %p80_p0 = scmp.ne.s32.totalorder %s646_s11, %s642_s10 }
   0x7   : > { %p68_p1 = scmp.eq.s32.totalorder %s67_s17, 0  ;;  %p81_p2 = scmp.eq.s32.totalorder %s695_s13, 1 }
   0x8   : > { %p86_p3 = scmp.ne.s32.totalorder %s642_s10, %s638_s9  ;;  %p87_p4 = scmp.eq.s32.totalorder %s428_s14, 1 }
   0x9   : > { %s710_s18 = scalar_select %p68_p1, %s646_s11, %s70_s16  }
   0xa   : > { %p712_p5 = por %p81_p2, %p80_p0  ;;  %p716_p6 = por %p87_p4, %p86_p3 }
   0xb   : > { %p429_p7 = scmp.ge.s32.totalorder %s650_s12, 1  ;;  %p94_p8 = scmp.lt.s32.totalorder %s650_s12, 3 }
   0xc   : > { %s834_s19 = scalar_select %p712_p5, 1, 0 }
   0xd   : > { %s835_s20 = scalar_select %p716_p6, 1, 0 }
   0xe   : > { %p831_p9 = scmp.eq.s32.totalorder %s695_s13, 0  ;;  %p723_p10 = pnand %p429_p7, %p94_p8 }
   0xf   : > { %s652_s22 = smov [#allocation2]   ;;  %s556_s27 = scalar_lea.hbm %s829_s1, 1024 }
  0x10   : > { %s836_s21 = scalar_select %p723_p10, 1, 0 }
  0x11   : > { %s106_s23 = sshll.u32 %s652_s22, 4  ;;  %p506_p11 = pneg %p723_p10  ;;  %s107_s23 = int_to_ptr.vmem [resolvable:$true] %s106_s23 }
  0x12   : > { %p557_p13 = scmp.ne.s32.totalorder %s829_s1, %s556_s27  ;;  %p563_p3 = scmp.lt.u32.totalorder %s556_s27, %s829_s1 }
  0x13   : > { %p731_p12 = pnand %p831_p9, %p506_p11 }
  0x15   : > { %p558_p0 = pneg %p731_p12 }
  0x17   : > { %p559_p1 = pnand %p558_p0, %p557_p13 }
  0x19   : > { %p560_p2 = pneg %p559_p1 }
  0x1b   : > { %p565_p4 = pnand %p563_p3, %p560_p2 }
  0x1d   : > { %568 = shalt.err (!%p565_p4)
}
  0x1e   : > { %s569_s4 = scalar_lea.vmem %s107_s23, 1024  ;;  %p577_p9 = scmp.lt.s32.totalorder %s107_s23, %s107_s23 }
  0x1f   : > { %p570_p7 = scmp.ne.s32.totalorder %s107_s23, %s569_s4  ;;  %p578_p6 = scmp.lt.s32.totalorder %s569_s4, %s569_s4 }
  0x21   : > { %p572_p8 = pnand %p570_p7, %p558_p0  ;;  %p579_p5 = por %p578_p6, %p577_p9 }
  0x23   : > { %p573_p11 = pneg %p572_p8 }
  0x25   : > { %p580_p10 = pnand %p579_p5, %p573_p11 }
  0x27   : > { %583 = shalt.err (!%p580_p10)
}
  0x28   : > { %s653_s5 = smov 128   ;;  %s654_s6 = smov 8  }
  0x29   : > { %509 = dma.hbm_to_vmem [thread:$0]  (!%p731_p12), %s829_s1, 1024, %s107_s23, [#allocation3], %s653_s5, %s653_s5, %s654_s6  }
  0x2a   : > { %p838_p13 = scmp.ne.s32.totalorder %s836_s21, 0 }
  0x2b   : > { %p839_p1 = scmp.eq.s32.totalorder (!%p838_p13), %s695_s13, 0 }
  0x2c   : > { %129 = sbr.rel (%p838_p13) target bundleno = 435 (0x1b3), region = 28 }
  0x33   : > { %629 = dma.done.wait (%p839_p1), [#allocation3], 1024   ;;  %p840_p0 = pmov %p839_p1 }
  0x34   : > { %p150_p5 = scmp.lt.s32.totalorder %s695_s13, 1  ;;  %v655_v0 = vmov 0   ;;  %v656_v1 = vmov 0.0   ;;  %v162_v3 = vld [vmem:[#allocation2] sm:$0xff]  ;;  %v163_v4 = vld [vmem:[#allocation2 + $0x8] sm:$0xff]  ;;  %v164_v6 = vld [vmem:[#allocation2 + $0x10] sm:$0xff]  ;;  %v156_v55 = vlaneseq }
  0x35   : > { %631 = vsyncadd (%p840_p0), [#allocation3], 4294966272  ;;  %555 = vset.pattern.permute.xlu0 %v655_v0  ;;  %471 = vmatprep.subr.bf16.mxu0 %v656_v1  ;;  %v173_v5 = vpack.c.bf16 %v163_v4, %v162_v3  ;;  %v165_v7 = vld [vmem:[#allocation2 + $0x18] sm:$0xff]  ;;  %v166_v8 = vld [vmem:[#allocation2 + $0x20] sm:$0xff]  ;;  %vm657_vm0 = vmmov 0   ;;  %vm217_vm2 = vcmask 523264  }
  0x36   : > { %s151_s14 = scalar_select %p150_p5, %s695_s13, 1  ;;  %459 = vmatprep.subr.bf16.mxu1 %v656_v1  ;;  %v174_v9 = vpack.c.bf16 %v165_v7, %v164_v6  ;;  %v167_v10 = vld [vmem:[#allocation2 + $0x28] sm:$0xff]  ;;  %v168_v11 = vld [vmem:[#allocation2 + $0x30] sm:$0xff]  ;;  %v169_v12 = vld [vmem:[#allocation2 + $0x38] sm:$0xff]  ;;  %467 = vmatprep.mubr.msk.bf16.mxu1 %vm657_vm0, %v656_v1  ;;  %v157_v56 = vand.u32 127, %v156_v55 }
  0x37   : > { %472 = vmatpush3.bf16.msra.mxu0 %v173_v5  ;;  %v177_v13 = vunpack.c.l.bf16 %v173_v5  ;;  %v178_v14 = vunpack.c.h.bf16 %v173_v5  ;;  %v175_v15 = vpack.c.bf16 %v167_v10, %v166_v8  ;;  %v176_v16 = vpack.c.bf16 %v169_v12, %v168_v11  ;;  %479 = vmatprep.mubr.msk.bf16.mxu0 %vm657_vm0, %v656_v1  ;;  %s147_s23 = sand.u32 1, %s642_s10   ;;  %s441_s25 = sshll.u32 %s695_s13, 7 }
  0x38   : > { %s435_s16 = sshll.u32 %s151_s14, 3  ;;  %473 = vmatprep.subr.bf16.mxu0 %v656_v1  ;;  %v179_v17 = vunpack.c.l.bf16 %v174_v9  ;;  %v180_v18 = vunpack.c.h.bf16 %v174_v9  ;;  %s434_s24 = sshll.u32 %s147_s23, 3 }
  0x39   : > { %s153_s22 = scalar_lea.vmem %s828_s0, %s435_s16  ;;  %v185_v19 = vsub.f32 %v162_v3, %v177_v13  ;;  %v186_v20 = vsub.f32 %v163_v4, %v178_v14  ;;  %v181_v21 = vunpack.c.l.bf16 %v175_v15  ;;  %v182_v22 = vunpack.c.h.bf16 %v175_v15  ;;  %s149_s26 = scalar_lea.vmem [#allocation5], %s434_s24 }
  0x3a   : > { %v155_v2 = vld [vmem:[%s153_s22] sm:$0xff]  ;;  %v187_v23 = vsub.f32 %v164_v6, %v179_v17  ;;  %v188_v24 = vsub.f32 %v165_v7, %v180_v18  ;;  %v183_v25 = vunpack.c.l.bf16 %v176_v16  ;;  %v184_v26 = vunpack.c.h.bf16 %v176_v16  ;;  %s357_s27 = sshll.u32 %s149_s26, 4  ;;  %s786_s30 = scalar_lea.hbm %s830_s2, %s441_s25  ;;  %s788_s27 = int_to_ptr.vmem [resolvable:$true] %s357_s27 }
  0x3b   : > { %159 = vperm.xlu0 %555, %v155_v2   ;;  %v193_v27 = vpack.c.bf16 %v186_v20, %v185_v19  ;;  %474 = vmatpush3.bf16.msra.mxu0 %v174_v9  ;;  %v189_v28 = vsub.f32 %v166_v8, %v181_v21  ;;  %v190_v29 = vsub.f32 %v167_v10, %v182_v22  ;;  %s344_s3 = scalar_lea.sflag [#allocation4], %s147_s23  ;;  %s584_s13 = scalar_lea.vmem %s788_s27, 128 }
  0x3c   : > { %v194_v30 = vpack.c.bf16 %v188_v24, %v187_v23  ;;  %475 = vmatprep.subr.bf16.mxu0 %v656_v1  ;;  %v191_v31 = vsub.f32 %v168_v11, %v183_v25  ;;  %v192_v32 = vsub.f32 %v169_v12, %v184_v26  ;;  %p585_p6 = scmp.ne.s32.totalorder %s788_s27, %s584_s13  ;;  %p841_p9 = scmp.ne.s32.totalorder %s834_s19, 0 }
  0x3d   : > { %v197_v33 = vunpack.c.l.bf16 %v193_v27  ;;  %v198_v34 = vunpack.c.h.bf16 %v193_v27  ;;  %460 = vmatpush3.bf16.msra.mxu1 %v193_v27  ;;  %v195_v35 = vpack.c.bf16 %v190_v29, %v189_v28  ;;  %s658_s4 = smov [#allocation5]  }
  0x3e   : > { %461 = vmatprep.subr.bf16.mxu1 %v656_v1  ;;  %v199_v36 = vunpack.c.l.bf16 %v194_v30  ;;  %v200_v37 = vunpack.c.h.bf16 %v194_v30  ;;  %v196_v38 = vpack.c.bf16 %v192_v32, %v191_v31  ;;  %p586_p10 = pnand %p585_p6, %p841_p9  ;;  %s588_s5 = sshll.u32 %s658_s4, 4  ;;  %s589_s5 = int_to_ptr.vmem [resolvable:$false] %s588_s5 }
  0x3f   : > { %v205_v39 = vsub.f32 %v185_v19, %v197_v33  ;;  %v206_v40 = vsub.f32 %v186_v20, %v198_v34  ;;  %476 = vmatpush3.bf16.msra.mxu0 %v175_v15  ;;  %v201_v41 = vunpack.c.l.bf16 %v195_v35  ;;  %v202_v42 = vunpack.c.h.bf16 %v195_v35  ;;  %s590_s6 = scalar_lea.vmem %s589_s5, 256  ;;  %p591_p2 = scmp.lt.s32.totalorder %s788_s27, %s589_s5 }
  0x40   : > { %v207_v43 = vsub.f32 %v187_v23, %v199_v36  ;;  %v208_v44 = vsub.f32 %v188_v24, %v200_v37  ;;  %477 = vmatprep.subr.bf16.mxu0 %v656_v1  ;;  %v203_v45 = vunpack.c.l.bf16 %v196_v38  ;;  %v204_v46 = vunpack.c.h.bf16 %v196_v38  ;;  %p587_p12 = pneg %p586_p10  ;;  %p592_p3 = scmp.lt.s32.totalorder %s590_s6, %s584_s13 }
  0x41   : > { %462 = vmatpush3.bf16.msra.mxu1 %v194_v30  ;;  %v209_v47 = vsub.f32 %v189_v28, %v201_v41  ;;  %v210_v48 = vsub.f32 %v190_v29, %v202_v42  ;;  %v213_v49 = vpack.c.bf16 %v206_v40, %v205_v39 }
  0x42   : > { %463 = vmatprep.subr.bf16.mxu1 %v656_v1  ;;  %v211_v50 = vsub.f32 %v191_v31, %v203_v45  ;;  %v212_v51 = vsub.f32 %v192_v32, %v204_v46  ;;  %v214_v52 = vpack.c.bf16 %v208_v44, %v207_v43  ;;  %p593_p4 = por %p592_p3, %p591_p2 }
  0x43   : > { %478 = vmatpush3.bf16.msra.mxu0 %v176_v16  ;;  %v215_v53 = vpack.c.bf16 %v210_v48, %v209_v47 }
  0x44   : > { %483 = vmatprep.subr.bf16.mxu0 %v656_v1  ;;  %v216_v54 = vpack.c.bf16 %v212_v51, %v211_v50  ;;  %p594_p7 = pnand %p593_p4, %p587_p12 }
  0x45   : > { %464 = vmatpush3.bf16.msra.mxu1 %v195_v35 }
  0x46   : > { %465 = vmatprep.subr.bf16.mxu1 %v656_v1 }
  0x49   : > { %466 = vmatpush3.bf16.msra.mxu1 %v196_v38 }
  0xba   : > { %v160_v57 = vpop.permute.xlu0 %159 }
  0xbb   : > { %vm161_vm1 = vcmp.eq.s32.totalorder %v160_v57, %v157_v56 }
  0xbc   : > { %v436_v58 = vsel %vm161_vm1, 1.0, %v656_v1 }
  0xbd   : > { %v172_v59 = vpack.c.bf16 %v436_v58, %v436_v58 }
  0xbf   : > { %468 = vmatmul.mubr.msk.bf16.vlgmr.msra.gmra.mrb[0].mxu1 %vm217_vm2, %v172_v59  ;;  %480 = vmatmul.mubr.msk.bf16.vlgmr.msra.gmra.mrb[0].mxu0 %vm217_vm2, %v172_v59 }
  0xc0   : > { %484 = vmatpush3.bf16.msra.mxu0 %v213_v49  ;;  %491 = vmatprep.mubr.msk.bf16.mxu0 %vm657_vm0, %v656_v1 }
  0xc1   : > { %485 = vmatprep.subr.bf16.mxu0 %v656_v1 }
  0xc4   : > { %486 = vmatpush3.bf16.msra.mxu0 %v214_v52 }
  0xc5   : > { %487 = vmatprep.subr.bf16.mxu0 %v656_v1 }
  0xc8   : > { %488 = vmatpush3.bf16.msra.mxu0 %v215_v53 }
  0xc9   : > { %489 = vmatprep.subr.bf16.mxu0 %v656_v1 }
  0xcc   : > { %490 = vmatpush3.bf16.msra.mxu0 %v216_v54 }
  0xcf   : > { %492 = vmatmul.mubr.msk.bf16.vlgmr.msra.gmra.mrb[0].mxu0 %vm217_vm2, %v172_v59 }
 0x192   : > { %v255_v60 = vpop.f32.mrb[0].mxu1 }
 0x193   : > { %v469_v61 = vpop.f32.mrb[1].mxu1 }
 0x194   : > { %v258_v62 = vpop.f32.mrb[2].mxu1 }
 0x195   : > { %v470_v63 = vpop.f32.mrb[3].mxu1 }
 0x1a2   : > { %v335_v0 = vpop.f32.mrb[0].mxu0 }
 0x1a3   : > { %v495_v2 = vadd.f32 %v335_v0, %v255_v60  ;;  %v493_v3 = vpop.f32.mrb[1].mxu0 }
 0x1a4   : > { %v338_v1 = vpop.f32.mrb[2].mxu0 }
 0x1a5   : > { %342 = vst [vmem:[%s149_s26] sm:$0xff] %v495_v2  ;;  %v494_v4 = vpop.f32.mrb[3].mxu0 }
 0x1a6   : > { %597 = shalt.err (!%p594_p7)
}
 0x1a7   : > { %s598_s7 = scalar_lea.hbm %s786_s30, 128  ;;  %s602_s16 = scalar_lea.hbm %s830_s2, 256 }
 0x1a8   : > { %p599_p8 = scmp.ne.s32.totalorder %s786_s30, %s598_s7  ;;  %p603_p1 = scmp.lt.u32.totalorder %s786_s30, %s830_s2 }
 0x1a9   : > { %p604_p0 = scmp.lt.u32.totalorder %s602_s16, %s598_s7  ;;  %p606_p6 = scmp.lt.u32.totalorder %s598_s7, %s786_s30 }
 0x1aa   : > { %p600_p11 = pnand %p599_p8, %p841_p9 }
 0x1ab   : > { %p605_p5 = por %p604_p0, %p603_p1 }
 0x1ac   : > { %p601_p13 = pneg %p600_p11 }
 0x1ad   : > { %p607_p10 = por %p606_p6, %p605_p5 }
 0x1af   : > { %p608_p12 = pnand %p607_p10, %p601_p13 }
 0x1b1   : > { %611 = shalt.err (!%p608_p12)
}
 0x1b2   : > { %504 = dma.vmem_to_hbm [thread:$0]  (%p841_p9), %s788_s27, 128, %s786_s30, %s344_s3  }
 0x1b3 PF: > { %p516_p2 = scmp.ge.s32.totalorder %s650_s12, 2  ;;  %s369_s22 = sand.u32 1, %s638_s9  }
 0x1b4   : > { %p842_p3 = scmp.ne.s32.totalorder %s835_s20, 0  ;;  %s370_s23 = scalar_lea.sflag [#allocation4], %s369_s22 }
 0x1b6   : > { %p511_p4 = pnand %p516_p2, %p842_p3 }
 0x1b8   : > { %633 = dma.done.wait (!%p511_p4), %s370_s23, 128  }
 0x1b9   : > { %635 = vsyncadd (!%p511_p4), %s370_s23, 4294967168  ;;  %p13_p7 = scmp.ge.s32.totalorder %s699_s15, 4   ;;  %s843_s9 = smov %s642_s10 }
 0x1ba   : > { %s844_s10 = smov %s646_s11  ;;  %s845_s11 = smov %s710_s18 }
 0x1bb   : > { %s846_s12 = smov %s699_s15  ;;  %15 = sbr.rel (!%p13_p7) target bundleno = 4 (0x4), region = 68 }
 0x1c2   :  { %375 = vsyncpa [#allocation3], 1 }
 0x1c3   :  { %377 = vsyncpa [#allocation3 + $0x1], 1 }
 0x1c4   :  { %378 = vsyncpa [#allocation4], 1 }
 0x1c5   :  { %380 = vsyncpa [#allocation4 + $0x1], 1 }

</bundles_post_ra>
